<compile_context>
chip_gen: v7x
topology: tpu7x:2x2x1
jax: 0.10.0
libtpu: 0.0.40
codegen_flags: <defaults>
</compile_context>

<pallas_src>
import functools

import jax
import jax.numpy as jnp
from jax import lax
from jax.experimental import pallas as pl
from jax.experimental.pallas import tpu as pltpu

_LANES = 128
_SUBLANES = 8
_TILE_ELEMS = _SUBLANES * _LANES          # 1024
_MAX_BLOCK_ROWS = 1024                    # (1024, 128) f32 block = 512 KiB
_FUSED_LIMIT_BYTES = 4 * 1024 * 1024      # keep whole signal resident below this
_VMEM_LIMIT_BYTES = 32 * 1024 * 1024      # explicit limit (v5e default is 16 MiB)


# -------------------- kernels --------------------

def _fused_norm_kernel(x_ref, o_ref, *, n, correction):
    """Whole signal resident in VMEM: two-pass (stable) mean/std + normalize."""
    xb = x_ref[...].astype(jnp.float32)
    mean = jnp.sum(xb) * (1.0 / n)
    centered = xb - mean
    var = jnp.sum(centered * centered) * (1.0 / (n - correction))
    inv_std = lax.rsqrt(var)                      # EUP, no per-element divide
    o_ref[...] = (centered * inv_std).astype(o_ref.dtype)


def _stats_kernel(x_ref, mean_ref, inv_std_ref, acc_sum, acc_sq, *, n, correction):
    """Tiled pass 1: lane-partial sum / sumsq in VMEM, finalize scalars once."""
    i = pl.program_id(0)

    @pl.when(i == 0)
    def _init():
        acc_sum[...] = jnp.zeros_like(acc_sum)
        acc_sq[...] = jnp.zeros_like(acc_sq)
        mean_ref[0, 0] = 0.0
        inv_std_ref[0, 0] = 1.0

    xb = x_ref[...].astype(jnp.float32)
    # Per-lane partial sums (cheap sublane reduce + VPU adds); the expensive
    # cross-lane reduce + scalar math happens only once, below.
    acc_sum[...] += jnp.sum(xb, axis=0, keepdims=True)
    acc_sq[...] += jnp.sum(xb * xb, axis=0, keepdims=True)

    @pl.when(i == pl.num_programs(0) - 1)
    def _finalize():
        s = jnp.sum(acc_sum[...])
        ss = jnp.sum(acc_sq[...])
        mean = s * (1.0 / n)
        # Single-pass variance; clamp to avoid NaN from rounding cancellation.
        # TODO(synk): compensated / two-pass accumulation for very long,
        # offset-heavy signals (matches torch.std numerics more tightly).
        var = jnp.maximum((ss - n * mean * mean) * (1.0 / (n - correction)), 0.0)
        mean_ref[0, 0] = mean
        inv_std_ref[0, 0] = lax.rsqrt(var)


def _apply_kernel(mean_ref, inv_std_ref, x_ref, o_ref):
    """Tiled pass 2: (x - mean) * inv_std with precomputed SMEM scalars."""
    mean = mean_ref[0, 0]
    inv = inv_std_ref[0, 0]
    xb = x_ref[...].astype(jnp.float32)
    o_ref[...] = ((xb - mean) * inv).astype(o_ref.dtype)


def _affine_kernel(x_ref, o_ref, *, mean, inv_std):
    """(x - mean) * (1/std) with compile-time constant scalars."""
    xb = x_ref[...].astype(jnp.float32)
    o_ref[...] = ((xb - mean) * inv_std).astype(o_ref.dtype)


# -------------------- helpers --------------------

def _pick_block_rows(n_rows):
    """Largest row-tile (multiple of 8, <= _MAX_BLOCK_ROWS) dividing n_rows."""
    for rows in (1024, 512, 256, 128, 64, 32, 16, 8):
        if rows <= n_rows and n_rows % rows == 0:
            return rows
    return n_rows


def _row_block_spec(rows):
    return pl.BlockSpec((rows, _LANES), lambda i: (i, 0))


# -------------------- wrapper --------------------

def normalize(x, mean=None, std=None, dim=-1, *,
              fused_limit_bytes=_FUSED_LIMIT_BYTES):
    """Pallas implementation of blvm Normalize.forward.

    Supported:
      * mean/std given as Python floats -> elementwise kernel.
      * mean=None, std=None with 1-D x and dim in (-1, 0) -> scalar mean /
        unbiased std over the whole signal, then normalization.
    """
    x = jnp.asarray(x)
    orig_shape = x.shape

    # -------- constant mean/std: pure elementwise --------
    if mean is not None and std is not None:
        flat = x.reshape(-1)
        assert flat.size % _TILE_ELEMS == 0, "affine path requires size % 1024 == 0"
        R = flat.size // _LANES
        x2 = flat.reshape(R, _LANES)
        rows = _pick_block_rows(R)
        out2 = pl.pallas_call(
            functools.partial(_affine_kernel, mean=float(mean),
                              inv_std=1.0 / float(std)),
            out_shape=jax.ShapeDtypeStruct(x2.shape, x.dtype),
            grid=(R // rows,),
            in_specs=[_row_block_spec(rows)],
            out_specs=_row_block_spec(rows),
            compiler_params=pltpu.CompilerParams(
                dimension_semantics=("parallel",),
                vmem_limit_bytes=_VMEM_LIMIT_BYTES),
        )(x2)
        return out2.reshape(orig_shape)

    # -------- computed-statistics path --------
    # TODO(synk): general N-D `dim` reductions (with PyTorch no-keepdim
    # broadcasting) and mixed (mean given, std computed) configurations are not
    # implemented; only the broadcast-valid 1-D case is.
    assert mean is None and std is None, "mixed mean/std config not supported"
    assert x.ndim == 1 and dim in (-1, 0), "computed-stats path supports 1-D x"
    T = x.shape[0]
    correction = 1.0  # unbiased std, like torch.Tensor.std default

    # Fused path: whole signal resident in VMEM -> one kernel, 2T HBM bytes,
    # numerically-stable two-pass variance.  Budget is conservative so it also
    # fits v7x's smaller (64 MiB physical / 32 MiB scoped) VMEM.
    if T % _LANES == 0 and T * x.dtype.itemsize <= fused_limit_bytes:
        R = T // _LANES
        x2 = x.reshape(R, _LANES)
        out2 = pl.pallas_call(
            functools.partial(_fused_norm_kernel, n=float(T),
                              correction=correction),
            out_shape=jax.ShapeDtypeStruct(x2.shape, x.dtype),
            in_specs=[pl.BlockSpec(memory_space=pltpu.MemorySpace.VMEM)],
            out_specs=pl.BlockSpec(memory_space=pltpu.MemorySpace.VMEM),
            compiler_params=pltpu.CompilerParams(
                vmem_limit_bytes=_VMEM_LIMIT_BYTES),
        )(x2)
        return out2.reshape(orig_shape)

    # Tiled path for long waveforms: two passes with large blocks.
    assert T % _TILE_ELEMS == 0, "tiled path requires T % 1024 == 0"
    # TODO(synk): masked tail tile for general lengths.
    R = T // _LANES
    x2 = x.reshape(R, _LANES)
    rows = _pick_block_rows(R)
    grid = (R // rows,)

    smem_scalar = pl.BlockSpec((1, 1), lambda i: (0, 0),
                               memory_space=pltpu.MemorySpace.SMEM)

    # Pass 1: global sum / sumsq -> mean and inv_std scalars (finalized once).
    # TODO(synk): split the reduction across v7x's two TensorCores (per-core
    # partials) instead of a single sequential "arbitrary" axis.
    mean_s, inv_std_s = pl.pallas_call(
        functools.partial(_stats_kernel, n=float(T), correction=correction),
        out_shape=(jax.ShapeDtypeStruct((1, 1), jnp.float32),
                   jax.ShapeDtypeStruct((1, 1), jnp.float32)),
        grid=grid,
        in_specs=[_row_block_spec(rows)],
        out_specs=(smem_scalar, smem_scalar),
        scratch_shapes=[pltpu.VMEM((1, _LANES), jnp.float32),
                        pltpu.VMEM((1, _LANES), jnp.float32)],
        compiler_params=pltpu.CompilerParams(
            dimension_semantics=("arbitrary",),
            vmem_limit_bytes=_VMEM_LIMIT_BYTES),
    )(x2)

    # Pass 2: normalize each block with the precomputed scalars (mul, not div).
    out2 = pl.pallas_call(
        _apply_kernel,
        out_shape=jax.ShapeDtypeStruct((R, _LANES), x.dtype),
        grid=grid,
        in_specs=[smem_scalar, smem_scalar, _row_block_spec(rows)],
        out_specs=_row_block_spec(rows),
        compiler_params=pltpu.CompilerParams(
            dimension_semantics=("parallel",),
            vmem_limit_bytes=_VMEM_LIMIT_BYTES),
    )(mean_s, inv_std_s, x2)

    return out2.reshape(orig_shape)


# -------------------- demo / check --------------------

if __name__ == "__main__":
    key = jax.random.PRNGKey(0)

    # Small 1-D waveform (module's typical input) -> fused resident-VMEM path.
    T = 4096
    x = jax.random.normal(key, (T,), dtype=jnp.float32) * 2.0 + 0.5

    y = jax.block_until_ready(normalize(x))

    # Plain-JAX reference matching torch semantics (unbiased std).
    mean_ref = jnp.mean(x)
    std_ref = jnp.sqrt(jnp.sum((x - mean_ref) ** 2) / (T - 1))
    y_ref = (x - mean_ref) / std_ref
    assert y.shape == x.shape and y.dtype == x.dtype
    assert jnp.allclose(y, y_ref, atol=1e-5, rtol=1e-5)

    # Same input forced through the tiled (large-T) path.
    y_t = jax.block_until_ready(normalize(x, fused_limit_bytes=0))
    assert jnp.allclose(y_t, y_ref, atol=1e-4, rtol=1e-4)

    # Larger signal to exercise multi-block stats accumulation (grid > 1).
    T2 = 256 * 1024
    xb = jax.random.normal(jax.random.PRNGKey(1), (T2,), dtype=jnp.float32) * 2.0 + 0.5
    yb = jax.block_until_ready(normalize(xb, fused_limit_bytes=0))
    m2 = jnp.mean(xb)
    s2 = jnp.sqrt(jnp.sum((xb - m2) ** 2) / (T2 - 1))
    assert jnp.allclose(yb, (xb - m2) / s2, atol=1e-4, rtol=1e-4)

    # Constant mean/std path.
    y3 = jax.block_until_ready(normalize(x, mean=0.5, std=2.0))
    assert jnp.allclose(y3, (x - 0.5) / 2.0, atol=1e-6, rtol=1e-6)

    print("KERNEL_OK")
</pallas_src>

<mosaic_0001>
module attributes {stable_mosaic.version = 11 : i64} {
  func.func @_fused_norm_kernel(%arg0: memref<32x128xf32, #tpu.memory_space<vmem>>, %arg1: memref<32x128xf32, #tpu.memory_space<vmem>>) attributes {dimension_semantics = [], scalar_prefetch = 0 : i64, scratch_operands = 0 : i64, tpu.core_type = #tpu.core_type<tc>} {
    %c0 = arith.constant 0 : index
    %c0_0 = arith.constant 0 : index
    %0 = vector.load %arg0[%c0, %c0_0] : memref<32x128xf32, #tpu.memory_space<vmem>>, vector<32x128xf32>
    %1 = vector.shape_cast %0 : vector<32x128xf32> to vector<1x32x128xf32>
    %cst = arith.constant dense<0.000000e+00> : vector<1xf32>
    %2 = vector.multi_reduction <add>, %1, %cst [1, 2] : vector<1x32x128xf32> to vector<1xf32>
    %3 = vector.shape_cast %2 : vector<1xf32> to vector<1x1x1xf32>
    %4 = vector.extract %3[0, 0, 0] : f32 from vector<1x1x1xf32>
    %cst_1 = arith.constant 2.44140625E-4 : f32
    %5 = arith.mulf %4, %cst_1 : f32
    %6 = vector.broadcast %5 : f32 to vector<32x128xf32>
    %7 = arith.subf %0, %6 : vector<32x128xf32>
    %8 = arith.mulf %7, %7 : vector<32x128xf32>
    %9 = vector.shape_cast %8 : vector<32x128xf32> to vector<1x32x128xf32>
    %cst_2 = arith.constant dense<0.000000e+00> : vector<1xf32>
    %10 = vector.multi_reduction <add>, %9, %cst_2 [1, 2] : vector<1x32x128xf32> to vector<1xf32>
    %11 = vector.shape_cast %10 : vector<1xf32> to vector<1x1x1xf32>
    %12 = vector.extract %11[0, 0, 0] : f32 from vector<1x1x1xf32>
    %cst_3 = arith.constant 2.44200259E-4 : f32
    %13 = arith.mulf %12, %cst_3 : f32
    %14 = math.rsqrt %13 : f32
    %15 = vector.broadcast %14 : f32 to vector<32x128xf32>
    %16 = arith.mulf %7, %15 : vector<32x128xf32>
    %c0_4 = arith.constant 0 : index
    %c0_5 = arith.constant 0 : index
    %17 = vector.load %arg1[%c0_4, %c0_5] : memref<32x128xf32, #tpu.memory_space<vmem>>, vector<32x128xf32>
    tpu.vector_store %arg1[%c0_4, %c0_5], %16 {strides = array<i32>} : memref<32x128xf32, #tpu.memory_space<vmem>>, vector<32x128xf32>,
    return
  }
}

</mosaic_0001>

<bundles_post_ra>
// kernel: tpu_custom_call.1
= control target key start
LH: loop header
LB: loop body
LE: loop exit
PB: predicated region body
PF: predicated region fallthrough
CT: control target
= control target key end

     0   :  { %6 = vsyncpa [#allocation3], 0  ;;  %s195_s0 = inlined_call_operand.hbm [shape: f32[32,128], index: 0, kind: input, shape index: {}]   ;;  %s196_s1 = inlined_call_operand.hbm [shape: f32[32,128], index: 1, kind: output, shape index: {}]  }
   0x1   :  { %7 = vsyncpa [#allocation4], 0  ;;  %s151_s6 = smov [#allocation2]   ;;  %s103_s10 = scalar_lea.hbm %s195_s0, 512 }
   0x2   :  { %s13_s7 = sshll.u32 %s151_s6, 4  ;;  %p104_p0 = scmp.ne.s32.totalorder %s195_s0, %s103_s10  ;;  %s14_s7 = int_to_ptr.vmem [resolvable:$true] %s13_s7 }
   0x3   :  { %p107_p1 = scmp.lt.u32.totalorder %s103_s10, %s195_s0 }
   0x5   :  { %p109_p2 = pnand %p107_p1, %p104_p0 }
   0x7   :  { %112 = shalt.err (!%p109_p2)
}
   0x8   :  { %s113_s15 = scalar_lea.vmem %s14_s7, 512  ;;  %p118_p4 = scmp.lt.s32.totalorder %s14_s7, %s14_s7 }
   0x9   :  { %p114_p3 = scmp.ne.s32.totalorder %s14_s7, %s113_s15  ;;  %p119_p5 = scmp.lt.s32.totalorder %s113_s15, %s113_s15 }
   0xb   :  { %p120_p6 = por %p119_p5, %p118_p4 }
   0xd   :  { %p121_p7 = pnand %p120_p6, %p114_p3 }
   0xf   :  { %124 = shalt.err (!%p121_p7)
}
  0x10   :  { %s152_s16 = smov 128   ;;  %s153_s17 = smov 8  }
  0x11   :  { %19 = dma.hbm_to_vmem [thread:$0]  %s195_s0, 512, %s14_s7, [#allocation3], %s152_s16, %s152_s16, %s153_s17  }
  0x12   :  { %147 = dma.done.wait [#allocation3], 512  }
  0x13   :  { %148 = vsyncadd [#allocation3], 4294966784  ;;  %v23_v0 = vld [vmem:[#allocation2] sm:$0xff]  ;;  %v24_v1 = vld [vmem:[#allocation2 + $0x8] sm:$0xff]  ;;  %s154_s23 = smov [#allocation5]  }
  0x14   :  { %v25_v2 = vld [vmem:[#allocation2 + $0x10] sm:$0xff]  ;;  %v27_v3 = vadd.f32 %v24_v1, %v23_v0  ;;  %v26_v4 = vld [vmem:[#allocation2 + $0x18] sm:$0xff]  ;;  %s79_s24 = sshll.u32 %s154_s23, 4  ;;  %s80_s24 = int_to_ptr.vmem [resolvable:$true] %s79_s24 }
  0x15   :  { %s125_s26 = scalar_lea.vmem %s80_s24, 512  ;;  %p130_p9 = scmp.lt.s32.totalorder %s80_s24, %s80_s24 }
  0x16   :  { %v28_v5 = vadd.f32 %v27_v3, %v25_v2  ;;  %p126_p8 = scmp.ne.s32.totalorder %s80_s24, %s125_s26  ;;  %p131_p10 = scmp.lt.s32.totalorder %s125_s26, %s125_s26 }
  0x18   :  { %v29_v6 = vadd.f32 %v28_v5, %v26_v4  ;;  %p132_p11 = por %p131_p10, %p130_p9 }
  0x1a   :  { %30 = vadd.xlane.f32.xlu0 %v29_v6  ;;  %p133_p12 = pnand %p132_p11, %p126_p8 }
  0xa7   :  { %v31_v7 = vpop.xlane.xlu0 %30 }
  0xa8   :  { %v32_v8 = vrot.slane %v31_v7, 4 }
  0xaa   :  { %v33_v9 = vadd.f32 %v32_v8, %v31_v7 }
  0xac   :  { %v34_v10 = vrot.slane %v33_v9, 2 }
  0xae   :  { %v35_v11 = vadd.f32 %v34_v10, %v33_v9 }
  0xb0   :  { %v36_v12 = vrot.slane %v35_v11, 1 }
  0xb2   :  { %v37_v13 = vadd.f32 %v36_v12, %v35_v11 }
  0xb4   :  { %91 = vpush %v37_v13 }
  0xe5   :  { %s92_s20 = spop %91 }
  0xe6   :  { %s39_s0 = smul.f32 0.00024414063, %s92_s20 }
  0xe8   :  { %v40_v14 = vstv %s39_s0 }
  0xe9   :  { %v41_v15 = vsub.f32 %v23_v0, %v40_v14  ;;  %v42_v16 = vsub.f32 %v24_v1, %v40_v14  ;;  %v43_v17 = vsub.f32 %v25_v2, %v40_v14  ;;  %v44_v18 = vsub.f32 %v26_v4, %v40_v14 }
  0xeb   :  { %v45_v19 = vmul.f32 %v41_v15, %v41_v15  ;;  %v46_v20 = vmul.f32 %v42_v16, %v42_v16  ;;  %v47_v21 = vmul.f32 %v43_v17, %v43_v17  ;;  %v48_v23 = vmul.f32 %v44_v18, %v44_v18 }
  0xed   :  { %v49_v22 = vadd.f32 %v46_v20, %v45_v19 }
  0xef   :  { %v50_v24 = vadd.f32 %v49_v22, %v47_v21 }
  0xf1   :  { %v51_v25 = vadd.f32 %v50_v24, %v48_v23 }
  0xf3   :  { %52 = vadd.xlane.f32.xlu0 %v51_v25 }
 0x180   :  { %v53_v26 = vpop.xlane.xlu0 %52 }
 0x181   :  { %v54_v27 = vrot.slane %v53_v26, 4 }
 0x183   :  { %v55_v28 = vadd.f32 %v54_v27, %v53_v26 }
 0x185   :  { %v56_v29 = vrot.slane %v55_v28, 2 }
 0x187   :  { %v57_v30 = vadd.f32 %v56_v29, %v55_v28 }
 0x189   :  { %v58_v31 = vrot.slane %v57_v30, 1 }
 0x18b   :  { %v59_v32 = vadd.f32 %v58_v31, %v57_v30 }
 0x18d   :  { %93 = vpush %v59_v32 }
 0x1be   :  { %s94_s21 = spop %93 }
 0x1bf   :  { %s61_s22 = smul.f32 0.00024420026, %s94_s21 }
 0x1c1   :  { %v62_v33 = vstv %s61_s22 }
 0x1c2   :  { %101 = vrsqrt.f32 %v62_v33 }
 0x1cc   :  { %v102_v34 = vpop.eup %101 }
 0x1cd   :  { %95 = vpush %v102_v34 }
 0x1fe   :  { %s96_s25 = spop %95 }
 0x1ff   :  { %v65_v35 = vstv %s96_s25 }
 0x200   :  { %v66_v36 = vmul.f32 %v65_v35, %v41_v15  ;;  %v67_v37 = vmul.f32 %v65_v35, %v42_v16  ;;  %v68_v38 = vmul.f32 %v65_v35, %v43_v17  ;;  %v69_v39 = vmul.f32 %v65_v35, %v44_v18 }
 0x202   :  { %70 = vst [vmem:[#allocation5] sm:$0xff] %v66_v36  ;;  %71 = vst [vmem:[#allocation5 + $0x8] sm:$0xff] %v67_v37 }
 0x203   :  { %72 = vst [vmem:[#allocation5 + $0x10] sm:$0xff] %v68_v38  ;;  %73 = vst [vmem:[#allocation5 + $0x18] sm:$0xff] %v69_v39 }
 0x204   :  { %136 = shalt.err (!%p133_p12)
}
 0x205   :  { %s137_s29 = scalar_lea.hbm %s196_s1, 512 }
 0x206   :  { %p138_p13 = scmp.ne.s32.totalorder %s196_s1, %s137_s29  ;;  %p141_p0 = scmp.lt.u32.totalorder %s137_s29, %s196_s1 }
 0x208   :  { %p143_p1 = pnand %p141_p0, %p138_p13 }
 0x20a   :  { %146 = shalt.err (!%p143_p1)
}
 0x20b   :  { %85 = dma.vmem_to_hbm [thread:$0]  %s80_s24, 512, %s196_s1, [#allocation4], %s152_s16, %s152_s16, %s153_s17  }
 0x20c   :  { %149 = dma.done.wait [#allocation4], 512  }
 0x20d   :  { %150 = vsyncadd [#allocation4], 4294966784 }
 0x20e   :  { %89 = vsyncpa [#allocation3], 1 }
 0x20f   :  { %90 = vsyncpa [#allocation4], 1 }

</bundles_post_ra>
